<compile_context>
chip_gen: v7x
topology: tpu7x:2x2x1
jax: 0.10.0
libtpu: 0.0.40
codegen_flags: <defaults>
</compile_context>

<pallas_src>
import math
import jax
import jax.numpy as jnp
from jax import lax
from jax.experimental import pallas as pl
from jax.experimental.pallas import tpu as pltpu

# ---------------- model config (small, deterministic) ----------------
VOCAB_SIZE = 64
D_MODEL = 32
BATCH = 2
SEQ = 8
LN_EPS = 1e-5                      # PyTorch nn.LayerNorm default

DP = 128                           # d_model padded to full lane width
VP = 128                           # vocab padded to full lane width
SQRT_D = math.sqrt(D_MODEL)


# ---------------- Pallas kernel (single invocation, fully fused) ----------------
def _make_kernel(n_tokens, d_model, vocab_pad, d_pad, eps):
    def kernel(ids_ref,                          # VMEM (N,1)   int32
               emb_ref, pos_ref,                 # VMEM (VP,DP), (N,DP)
               g1_ref, b1_ref, g2_ref, b2_ref,   # VMEM (1,DP) each
               w_ref, bias_ref,                  # VMEM (DP,VP), (1,VP)
               out_ref):                         # VMEM (N,VP)
        # ---- embedding gather as a one-hot MXU matmul (no scalar loop, no
        # scratch round trip); table is pre-scaled by sqrt(d_model) ----
        ids = ids_ref[...]                                       # (N, 1)
        vlane = lax.broadcasted_iota(jnp.int32, (n_tokens, vocab_pad), 1)
        one_hot = (vlane == ids).astype(jnp.float32)             # (N, VP)
        x = jnp.dot(one_hot, emb_ref[...],
                    preferred_element_type=jnp.float32,
                    precision=lax.Precision.HIGHEST) + pos_ref[...]

        # Lanes >= d_model are zero padding; mask keeps LN variance exact
        # (PyTorch LayerNorm: biased variance, eps inside rsqrt).
        lane = lax.broadcasted_iota(jnp.int32, (n_tokens, d_pad), 1)
        mask = (lane < d_model).astype(jnp.float32)
        inv_d = 1.0 / d_model

        def layer_norm(v, g_ref, b_ref):
            # padded lanes of v are exactly zero on entry -> no mask on mean
            mu = jnp.sum(v, axis=-1, keepdims=True) * inv_d
            diff = v - mu
            dm = diff * mask
            var = jnp.sum(dm * dm, axis=-1, keepdims=True) * inv_d
            # padded gamma/beta are zero -> padded output lanes stay zero
            return diff * lax.rsqrt(var + eps) * g_ref[...] + b_ref[...]

        x = layer_norm(x, g1_ref, b1_ref)                        # input_norm
        # input_dropout: eval mode -> identity (no-op)
        # TODO(synk): transformer_forward is abstract (NotImplementedError) in
        # BaseTransformer; treated as identity here.
        x = layer_norm(x, g2_ref, b2_ref)                        # final_norm

        # ---- final Linear: (N, DP) @ (DP, VP) + (1, VP); lane-dense store ----
        out_ref[...] = (
            jnp.dot(x, w_ref[...],
                    preferred_element_type=jnp.float32,
                    precision=lax.Precision.HIGHEST)
            + bias_ref[...]
        )

    return kernel


def base_transformer_forward(token_ids, params):
    """token_ids: int32 [B, S] -> logits float32 [B, S, V]."""
    B, S = token_ids.shape
    N = B * S
    emb = params["embedding"]       # (VP, DP), pre-scaled by sqrt(d_model)
    pos = params["pos_encoding"]    # (N, DP), pre-tiled over batch
    assert pos.shape == (N, DP), "pos table was tiled for a different (B, S)"
    ids = token_ids.reshape(N, 1).astype(jnp.int32)

    kernel = _make_kernel(N, D_MODEL, VP, DP, LN_EPS)

    grid_spec = pltpu.PrefetchScalarGridSpec(
        num_scalar_prefetch=0,
        grid=(1,),                              # everything in one step
        in_specs=[
            pl.BlockSpec((N, 1),   lambda i: (0, 0)),  # token ids
            pl.BlockSpec((VP, DP), lambda i: (0, 0)),  # embedding (pre-scaled)
            pl.BlockSpec((N, DP),  lambda i: (0, 0)),  # pos (pre-tiled)
            pl.BlockSpec((1, DP),  lambda i: (0, 0)),  # ln1 gamma
            pl.BlockSpec((1, DP),  lambda i: (0, 0)),  # ln1 beta
            pl.BlockSpec((1, DP),  lambda i: (0, 0)),  # ln2 gamma
            pl.BlockSpec((1, DP),  lambda i: (0, 0)),  # ln2 beta
            pl.BlockSpec((DP, VP), lambda i: (0, 0)),  # final W
            pl.BlockSpec((1, VP),  lambda i: (0, 0)),  # final b
        ],
        out_specs=pl.BlockSpec((N, VP), lambda i: (0, 0)),
    )

    logits_padded = pl.pallas_call(
        kernel,
        out_shape=jax.ShapeDtypeStruct((N, VP), jnp.float32),
        grid_spec=grid_spec,
        compiler_params=pltpu.CompilerParams(
            dimension_semantics=("arbitrary",)),
    )(ids, emb, pos,
      params["ln1_g"], params["ln1_b"],
      params["ln2_g"], params["ln2_b"],
      params["final_w"], params["final_b"])

    # drop lane padding, restore [B, S, V]
    return logits_padded[:, :VOCAB_SIZE].reshape(B, S, VOCAB_SIZE)


# ---------------- deterministic parameter init (pre-padded layout) ----------------
def _pad2(a, rows, cols):
    r, c = a.shape
    return jnp.pad(a, ((0, rows - r), (0, cols - c)))


def make_params(key, batch=BATCH, seq=SEQ):
    k_emb, k_fin = jax.random.split(key, 2)
    embedding = 0.02 * jax.random.normal(k_emb, (VOCAB_SIZE, D_MODEL),
                                         dtype=jnp.float32)

    # standard sinusoidal positional encoding, pre-tiled over batch
    position = jnp.arange(seq, dtype=jnp.float32)[:, None]            # [S, 1]
    div_term = jnp.exp(jnp.arange(0, D_MODEL, 2, dtype=jnp.float32)
                       * (-math.log(10000.0) / D_MODEL))              # [D/2]
    pe = jnp.zeros((seq, D_MODEL), dtype=jnp.float32)
    pe = pe.at[:, 0::2].set(jnp.sin(position * div_term))
    pe = pe.at[:, 1::2].set(jnp.cos(position * div_term))
    pe_tiled = jnp.tile(pe, (batch, 1))                                # [B*S, D]

    final_w = 0.02 * jax.random.normal(k_fin, (D_MODEL, VOCAB_SIZE),
                                       dtype=jnp.float32)

    # Zero-pad all parameters to lane-dense (multiple-of-128) shapes.  The
    # padded lanes/rows are mathematically inert (gamma/beta/W/b/table padded
    # with zeros) and the kernel output is sliced back to the real vocab size.
    # sqrt(d_model) is folded into the embedding table (x = emb(x)*sqrt(d)).
    return {
        "embedding": _pad2(embedding * SQRT_D, VP, DP),
        "pos_encoding": _pad2(pe_tiled, batch * seq, DP),
        "ln1_g": _pad2(jnp.ones((1, D_MODEL), jnp.float32), 1, DP),
        "ln1_b": jnp.zeros((1, DP), jnp.float32),
        "ln2_g": _pad2(jnp.ones((1, D_MODEL), jnp.float32), 1, DP),
        "ln2_b": jnp.zeros((1, DP), jnp.float32),
        "final_w": _pad2(final_w, DP, VP),
        "final_b": jnp.zeros((1, VP), jnp.float32),
    }


if __name__ == "__main__":
    key = jax.random.PRNGKey(0)
    k_tok, k_params = jax.random.split(key)
    token_ids = jax.random.randint(k_tok, (BATCH, SEQ), 0, VOCAB_SIZE,
                                   dtype=jnp.int32)
    params = make_params(k_params, BATCH, SEQ)

    logits = base_transformer_forward(token_ids, params)
    jax.block_until_ready(logits)

    assert logits.shape == (BATCH, SEQ, VOCAB_SIZE)
    assert logits.dtype == jnp.float32
    print("KERNEL_OK")
</pallas_src>

<mosaic_0001>
module attributes {stable_mosaic.version = 11 : i64} {
  func.func @kernel(%arg0: i32, %arg1: memref<16x1xi32, #tpu.memory_space<vmem>>, %arg2: memref<128x128xf32, #tpu.memory_space<vmem>>, %arg3: memref<16x128xf32, #tpu.memory_space<vmem>>, %arg4: memref<1x128xf32, #tpu.memory_space<vmem>>, %arg5: memref<1x128xf32, #tpu.memory_space<vmem>>, %arg6: memref<1x128xf32, #tpu.memory_space<vmem>>, %arg7: memref<1x128xf32, #tpu.memory_space<vmem>>, %arg8: memref<128x128xf32, #tpu.memory_space<vmem>>, %arg9: memref<1x128xf32, #tpu.memory_space<vmem>>, %arg10: memref<16x128xf32, #tpu.memory_space<vmem>>) attributes {dimension_semantics = [#tpu.dimension_semantics<arbitrary>], iteration_bounds = array<i64: 1>, scalar_prefetch = 0 : i64, scratch_operands = 0 : i64, tpu.core_type = #tpu.core_type<tc>, window_params = [{pipeline_mode = #tpu.pipeline_mode<synchronous>, transform_indices = @transform_0, window_bounds = array<i64: 16, 1>}, {pipeline_mode = #tpu.pipeline_mode<synchronous>, transform_indices = @transform_1, window_bounds = array<i64: 128, 128>}, {pipeline_mode = #tpu.pipeline_mode<synchronous>, transform_indices = @transform_2, window_bounds = array<i64: 16, 128>}, {pipeline_mode = #tpu.pipeline_mode<synchronous>, transform_indices = @transform_3, window_bounds = array<i64: 1, 128>}, {pipeline_mode = #tpu.pipeline_mode<synchronous>, transform_indices = @transform_4, window_bounds = array<i64: 1, 128>}, {pipeline_mode = #tpu.pipeline_mode<synchronous>, transform_indices = @transform_5, window_bounds = array<i64: 1, 128>}, {pipeline_mode = #tpu.pipeline_mode<synchronous>, transform_indices = @transform_6, window_bounds = array<i64: 1, 128>}, {pipeline_mode = #tpu.pipeline_mode<synchronous>, transform_indices = @transform_7, window_bounds = array<i64: 128, 128>}, {pipeline_mode = #tpu.pipeline_mode<synchronous>, transform_indices = @transform_8, window_bounds = array<i64: 1, 128>}, {pipeline_mode = #tpu.pipeline_mode<synchronous>, transform_indices = @transform_9, window_bounds = array<i64: 16, 128>}]} {
    %c0 = arith.constant 0 : index
    %c0_0 = arith.constant 0 : index
    %0 = vector.load %arg1[%c0, %c0_0] : memref<16x1xi32, #tpu.memory_space<vmem>>, vector<16x1xi32>
    %1 = tpu.iota {dimensions = array<i32: 1>} : vector<16x128xi32>
    %2 = vector.broadcast %0 : vector<16x1xi32> to vector<16x128xi32>
    %3 = arith.cmpi eq, %1, %2 : vector<16x128xi32>
    %4 = arith.extui %3 : vector<16x128xi1> to vector<16x128xi32>
    %5 = arith.sitofp %4 : vector<16x128xi32> to vector<16x128xf32>
    %c0_1 = arith.constant 0 : index
    %c0_2 = arith.constant 0 : index
    %6 = vector.load %arg2[%c0_1, %c0_2] : memref<128x128xf32, #tpu.memory_space<vmem>>, vector<128x128xf32>
    %cst = arith.constant dense<0.000000e+00> : vector<16x128xf32>
    %7 = tpu.matmul %5, %6, %cst {dimension_numbers = #tpu.dot_dimension_numbers<[1], [0], [0], [1], [0, 0, 1, 1], [], []>, precision = #tpu.contract_precision<fp32>} : vector<16x128xf32>, vector<128x128xf32>, vector<16x128xf32> -> vector<16x128xf32>
    %c0_3 = arith.constant 0 : index
    %c0_4 = arith.constant 0 : index
    %8 = vector.load %arg3[%c0_3, %c0_4] : memref<16x128xf32, #tpu.memory_space<vmem>>, vector<16x128xf32>
    %9 = arith.addf %7, %8 : vector<16x128xf32>
    %10 = tpu.iota {dimensions = array<i32: 1>} : vector<16x128xi32>
    %c32_i32 = arith.constant 32 : i32
    %11 = vector.broadcast %c32_i32 : i32 to vector<16x128xi32>
    %12 = arith.cmpi slt, %10, %11 : vector<16x128xi32>
    %13 = arith.extui %12 : vector<16x128xi1> to vector<16x128xi32>
    %14 = arith.sitofp %13 : vector<16x128xi32> to vector<16x128xf32>
    %cst_5 = arith.constant dense<0.000000e+00> : vector<16xf32>
    %15 = vector.multi_reduction <add>, %9, %cst_5 [1] : vector<16x128xf32> to vector<16xf32>
    %16 = vector.shape_cast %15 : vector<16xf32> to vector<16x1xf32>
    %cst_6 = arith.constant 3.125000e-02 : f32
    %17 = vector.broadcast %cst_6 : f32 to vector<16x1xf32>
    %18 = arith.mulf %16, %17 : vector<16x1xf32>
    %19 = vector.broadcast %18 : vector<16x1xf32> to vector<16x128xf32>
    %20 = arith.subf %9, %19 : vector<16x128xf32>
    %21 = arith.mulf %20, %14 : vector<16x128xf32>
    %22 = arith.mulf %21, %21 : vector<16x128xf32>
    %cst_7 = arith.constant dense<0.000000e+00> : vector<16xf32>
    %23 = vector.multi_reduction <add>, %22, %cst_7 [1] : vector<16x128xf32> to vector<16xf32>
    %24 = vector.shape_cast %23 : vector<16xf32> to vector<16x1xf32>
    %cst_8 = arith.constant 3.125000e-02 : f32
    %25 = vector.broadcast %cst_8 : f32 to vector<16x1xf32>
    %26 = arith.mulf %24, %25 : vector<16x1xf32>
    %cst_9 = arith.constant 9.99999974E-6 : f32
    %27 = vector.broadcast %cst_9 : f32 to vector<16x1xf32>
    %28 = arith.addf %26, %27 : vector<16x1xf32>
    %29 = math.rsqrt %28 : vector<16x1xf32>
    %30 = vector.broadcast %29 : vector<16x1xf32> to vector<16x128xf32>
    %31 = arith.mulf %20, %30 : vector<16x128xf32>
    %c0_10 = arith.constant 0 : index
    %c0_11 = arith.constant 0 : index
    %32 = vector.load %arg4[%c0_10, %c0_11] : memref<1x128xf32, #tpu.memory_space<vmem>>, vector<1x128xf32>
    %33 = vector.broadcast %32 : vector<1x128xf32> to vector<16x128xf32>
    %34 = arith.mulf %31, %33 : vector<16x128xf32>
    %c0_12 = arith.constant 0 : index
    %c0_13 = arith.constant 0 : index
    %35 = vector.load %arg5[%c0_12, %c0_13] : memref<1x128xf32, #tpu.memory_space<vmem>>, vector<1x128xf32>
    %36 = vector.broadcast %35 : vector<1x128xf32> to vector<16x128xf32>
    %37 = arith.addf %34, %36 : vector<16x128xf32>
    %cst_14 = arith.constant dense<0.000000e+00> : vector<16xf32>
    %38 = vector.multi_reduction <add>, %37, %cst_14 [1] : vector<16x128xf32> to vector<16xf32>
    %39 = vector.shape_cast %38 : vector<16xf32> to vector<16x1xf32>
    %cst_15 = arith.constant 3.125000e-02 : f32
    %40 = vector.broadcast %cst_15 : f32 to vector<16x1xf32>
    %41 = arith.mulf %39, %40 : vector<16x1xf32>
    %42 = vector.broadcast %41 : vector<16x1xf32> to vector<16x128xf32>
    %43 = arith.subf %37, %42 : vector<16x128xf32>
    %44 = arith.mulf %43, %14 : vector<16x128xf32>
    %45 = arith.mulf %44, %44 : vector<16x128xf32>
    %cst_16 = arith.constant dense<0.000000e+00> : vector<16xf32>
    %46 = vector.multi_reduction <add>, %45, %cst_16 [1] : vector<16x128xf32> to vector<16xf32>
    %47 = vector.shape_cast %46 : vector<16xf32> to vector<16x1xf32>
    %cst_17 = arith.constant 3.125000e-02 : f32
    %48 = vector.broadcast %cst_17 : f32 to vector<16x1xf32>
    %49 = arith.mulf %47, %48 : vector<16x1xf32>
    %cst_18 = arith.constant 9.99999974E-6 : f32
    %50 = vector.broadcast %cst_18 : f32 to vector<16x1xf32>
    %51 = arith.addf %49, %50 : vector<16x1xf32>
    %52 = math.rsqrt %51 : vector<16x1xf32>
    %53 = vector.broadcast %52 : vector<16x1xf32> to vector<16x128xf32>
    %54 = arith.mulf %43, %53 : vector<16x128xf32>
    %c0_19 = arith.constant 0 : index
    %c0_20 = arith.constant 0 : index
    %55 = vector.load %arg6[%c0_19, %c0_20] : memref<1x128xf32, #tpu.memory_space<vmem>>, vector<1x128xf32>
    %56 = vector.broadcast %55 : vector<1x128xf32> to vector<16x128xf32>
    %57 = arith.mulf %54, %56 : vector<16x128xf32>
    %c0_21 = arith.constant 0 : index
    %c0_22 = arith.constant 0 : index
    %58 = vector.load %arg7[%c0_21, %c0_22] : memref<1x128xf32, #tpu.memory_space<vmem>>, vector<1x128xf32>
    %59 = vector.broadcast %58 : vector<1x128xf32> to vector<16x128xf32>
    %60 = arith.addf %57, %59 : vector<16x128xf32>
    %c0_23 = arith.constant 0 : index
    %c0_24 = arith.constant 0 : index
    %61 = vector.load %arg8[%c0_23, %c0_24] : memref<128x128xf32, #tpu.memory_space<vmem>>, vector<128x128xf32>
    %cst_25 = arith.constant dense<0.000000e+00> : vector<16x128xf32>
    %62 = tpu.matmul %60, %61, %cst_25 {dimension_numbers = #tpu.dot_dimension_numbers<[1], [0], [0], [1], [0, 0, 1, 1], [], []>, precision = #tpu.contract_precision<fp32>} : vector<16x128xf32>, vector<128x128xf32>, vector<16x128xf32> -> vector<16x128xf32>
    %c0_26 = arith.constant 0 : index
    %c0_27 = arith.constant 0 : index
    %63 = vector.load %arg9[%c0_26, %c0_27] : memref<1x128xf32, #tpu.memory_space<vmem>>, vector<1x128xf32>
    %64 = vector.broadcast %63 : vector<1x128xf32> to vector<16x128xf32>
    %65 = arith.addf %62, %64 : vector<16x128xf32>
    %c0_28 = arith.constant 0 : index
    %c0_29 = arith.constant 0 : index
    %66 = vector.load %arg10[%c0_28, %c0_29] : memref<16x128xf32, #tpu.memory_space<vmem>>, vector<16x128xf32>
    tpu.vector_store %arg10[%c0_28, %c0_29], %65 {strides = array<i32>} : memref<16x128xf32, #tpu.memory_space<vmem>>, vector<16x128xf32>,
    return
  }
  func.func @transform_0(%arg0: i32) -> (i32, i32) {
    %c0_i32 = arith.constant 0 : i32
    %c0_i32_0 = arith.constant 0 : i32
    %c0_i32_1 = arith.constant 0 : i32
    return %c0_i32, %c0_i32_0 : i32, i32
  }
  func.func @transform_1(%arg0: i32) -> (i32, i32) {
    %c0_i32 = arith.constant 0 : i32
    %c0_i32_0 = arith.constant 0 : i32
    %c0_i32_1 = arith.constant 0 : i32
    return %c0_i32, %c0_i32_0 : i32, i32
  }
  func.func @transform_2(%arg0: i32) -> (i32, i32) {
    %c0_i32 = arith.constant 0 : i32
    %c0_i32_0 = arith.constant 0 : i32
    %c0_i32_1 = arith.constant 0 : i32
    return %c0_i32, %c0_i32_0 : i32, i32
  }
  func.func @transform_3(%arg0: i32) -> (i32, i32) {
    %c0_i32 = arith.constant 0 : i32
    %c0_i32_0 = arith.constant 0 : i32
    %c0_i32_1 = arith.constant 0 : i32
    return %c0_i32, %c0_i32_0 : i32, i32
  }
  func.func @transform_4(%arg0: i32) -> (i32, i32) {
    %c0_i32 = arith.constant 0 : i32
    %c0_i32_0 = arith.constant 0 : i32
    %c0_i32_1 = arith.constant 0 : i32
    return %c0_i32, %c0_i32_0 : i32, i32
  }
  func.func @transform_5(%arg0: i32) -> (i32, i32) {
    %c0_i32 = arith.constant 0 : i32
    %c0_i32_0 = arith.constant 0 : i32
    %c0_i32_1 = arith.constant 0 : i32
    return %c0_i32, %c0_i32_0 : i32, i32
  }
  func.func @transform_6(%arg0: i32) -> (i32, i32) {
    %c0_i32 = arith.constant 0 : i32
    %c0_i32_0 = arith.constant 0 : i32
    %c0_i32_1 = arith.constant 0 : i32
    return %c0_i32, %c0_i32_0 : i32, i32
  }
  func.func @transform_7(%arg0: i32) -> (i32, i32) {
    %c0_i32 = arith.constant 0 : i32
    %c0_i32_0 = arith.constant 0 : i32
    %c0_i32_1 = arith.constant 0 : i32
    return %c0_i32, %c0_i32_0 : i32, i32
  }
  func.func @transform_8(%arg0: i32) -> (i32, i32) {
    %c0_i32 = arith.constant 0 : i32
    %c0_i32_0 = arith.constant 0 : i32
    %c0_i32_1 = arith.constant 0 : i32
    return %c0_i32, %c0_i32_0 : i32, i32
  }
  func.func @transform_9(%arg0: i32) -> (i32, i32) {
    %c0_i32 = arith.constant 0 : i32
    %c0_i32_0 = arith.constant 0 : i32
    %c0_i32_1 = arith.constant 0 : i32
    return %c0_i32, %c0_i32_0 : i32, i32
  }
}

</mosaic_0001>

<bundles_post_ra>
// kernel: tpu_custom_call.1
= control target key start
LH: loop header
LB: loop body
LE: loop exit
PB: predicated region body
PF: predicated region fallthrough
CT: control target
= control target key end

     0   :  { %14 = vsyncpa [#allocation3], 0  ;;  %s3447_s0 = inlined_call_operand.vmem [shape: s32[16,1], index: 0, kind: input, shape index: {}]   ;;  %s3448_s1 = inlined_call_operand.hbm [shape: f32[128,128], index: 1, kind: input, shape index: {}]   ;;  %s3449_s2 = inlined_call_operand.vmem [shape: f32[16,128], index: 2, kind: input, shape index: {}]   ;;  %s3450_s3 = inlined_call_operand.vmem [shape: f32[1,128], index: 3, kind: input, shape index: {}]   ;;  %s3451_s4 = inlined_call_operand.vmem [shape: f32[1,128], index: 4, kind: input, shape index: {}]   ;;  %s3452_s5 = inlined_call_operand.vmem [shape: f32[1,128], index: 5, kind: input, shape index: {}]   ;;  %s3453_s6 = inlined_call_operand.vmem [shape: f32[1,128], index: 6, kind: input, shape index: {}]   ;;  %s3454_s7 = inlined_call_operand.hbm [shape: f32[128,128], index: 7, kind: input, shape index: {}]   ;;  %s3455_s8 = inlined_call_operand.vmem [shape: f32[1,128], index: 8, kind: input, shape index: {}]   ;;  %s3456_s9 = inlined_call_operand.hbm [shape: f32[16,128], index: 9, kind: output, shape index: {}]  }
   0x1   :  { %15 = vsyncpa [#allocation6], 0 }
   0x2   :  { %16 = vsyncpa [#allocation4], 0  ;;  %s2740_s30 = smov [#allocation2]   ;;  %s2668_s13 = scalar_lea.hbm %s3448_s1, 2048 }
   0x3   :  { %s24_s10 = sshll.u32 %s2740_s30, 4  ;;  %p2669_p0 = scmp.ne.s32.totalorder %s3448_s1, %s2668_s13  ;;  %s25_s10 = int_to_ptr.vmem [resolvable:$true] %s24_s10 }
   0x4   :  { %p2672_p1 = scmp.lt.u32.totalorder %s2668_s13, %s3448_s1 }
   0x6   :  { %p2674_p2 = pnand %p2672_p1, %p2669_p0 }
   0x8   :  { %2677 = shalt.err (!%p2674_p2)
}
   0x9   :  { %s2678_s18 = scalar_lea.vmem %s25_s10, 2048  ;;  %p2683_p4 = scmp.lt.s32.totalorder %s25_s10, %s25_s10 }
   0xa   :  { %p2679_p3 = scmp.ne.s32.totalorder %s25_s10, %s2678_s18  ;;  %p2684_p5 = scmp.lt.s32.totalorder %s2678_s18, %s2678_s18 }
   0xc   :  { %p2685_p6 = por %p2684_p5, %p2683_p4 }
   0xe   :  { %p2686_p7 = pnand %p2685_p6, %p2679_p3 }
  0x10   :  { %2689 = shalt.err (!%p2686_p7)
}
  0x11   :  { %s2741_s19 = smov 128   ;;  %s2742_s20 = smov 8  }
  0x12   :  { %30 = dma.hbm_to_vmem [thread:$0]  %s3448_s1, 2048, %s25_s10, [#allocation3], %s2741_s19, %s2741_s19, %s2742_s20  }
  0x13   :  { %s2743_s23 = smov [#allocation5]   ;;  %s2690_s27 = scalar_lea.hbm %s3454_s7, 2048 }
  0x14   :  { %s46_s24 = sshll.u32 %s2743_s23, 4  ;;  %p2691_p8 = scmp.ne.s32.totalorder %s3454_s7, %s2690_s27  ;;  %s47_s24 = int_to_ptr.vmem [resolvable:$true] %s46_s24 }
  0x15   :  { %p2694_p9 = scmp.lt.u32.totalorder %s2690_s27, %s3454_s7 }
  0x17   :  { %p2696_p10 = pnand %p2694_p9, %p2691_p8 }
  0x19   :  { %2699 = shalt.err (!%p2696_p10)
}
  0x1a   :  { %s2700_s12 = scalar_lea.vmem %s47_s24, 2048  ;;  %p2705_p12 = scmp.lt.s32.totalorder %s47_s24, %s47_s24 }
  0x1b   :  { %p2701_p11 = scmp.ne.s32.totalorder %s47_s24, %s2700_s12  ;;  %p2706_p13 = scmp.lt.s32.totalorder %s2700_s12, %s2700_s12 }
  0x1d   :  { %p2707_p0 = por %p2706_p13, %p2705_p12 }
  0x1f   :  { %p2708_p1 = pnand %p2707_p0, %p2701_p11 }
  0x21   :  { %2711 = shalt.err (!%p2708_p1)
}
  0x22   :  { %52 = dma.hbm_to_vmem [thread:$0]  %s3454_s7, 2048, %s47_s24, [#allocation6], %s2741_s19, %s2741_s19, %s2742_s20  }
  0x23   :  { %2734 = dma.done.wait [#allocation3], 2048  }
  0x24   :  { %2735 = vsyncadd [#allocation3], 4294965248 }
  0x25   :  { %2736 = dma.done.wait [#allocation6], 2048  }
  0x26   :  { %2737 = vsyncadd [#allocation6], 4294965248  ;;  %v2744_v0 = vmov 0   ;;  %v61_v1 = vld [vmem:[%s3447_s0] sm:$0xff]  ;;  %v77_v2 = vld [vmem:[#allocation2] sm:$0xff]  ;;  %s2747_s26 = smov [#allocation7]  }
  0x27   :  { %2659 = vset.pattern.permute.xlu0 %v2744_v0  ;;  %v78_v3 = vld [vmem:[#allocation2 + $0x8] sm:$0xff]  ;;  %v96_v4 = vand.u32 4294901760, %v77_v2  ;;  %v79_v5 = vld [vmem:[#allocation2 + $0x10] sm:$0xff]  ;;  %v80_v6 = vld [vmem:[#allocation2 + $0x18] sm:$0xff]  ;;  %s1580_s27 = sshll.u32 %s2747_s26, 4  ;;  %s1581_s27 = int_to_ptr.vmem [resolvable:$true] %s1580_s27 }
  0x28   :  { %66 = vperm.xlu0 %2659, %v61_v1   ;;  %v62_v7 = vld [vmem:[%s3447_s0 + $0x8] sm:$0xff]  ;;  %v99_v8 = vand.u32 4294901760, %v78_v3  ;;  %v102_v9 = vand.u32 4294901760, %v79_v5  ;;  %v105_v10 = vand.u32 4294901760, %v80_v6  ;;  %v82_v12 = vld [vmem:[#allocation2 + $0x28] sm:$0xff]  ;;  %v83_v17 = vld [vmem:[#allocation2 + $0x30] sm:$0xff]  ;;  %p2717_p3 = scmp.lt.s32.totalorder %s1581_s27, %s1581_s27 }
  0x29   :  { %v81_v11 = vld [vmem:[#allocation2 + $0x20] sm:$0xff]  ;;  %v111_v16 = vand.u32 4294901760, %v82_v12  ;;  %v84_v18 = vld [vmem:[#allocation2 + $0x38] sm:$0xff]  ;;  %v114_v20 = vand.u32 4294901760, %v83_v17  ;;  %v86_v23 = vld [vmem:[#allocation2 + $0x48] sm:$0xff]  ;;  %v2868_v45 = vsub.f32 %v77_v2, %v96_v4  ;;  %s2712_s28 = scalar_lea.vmem %s1581_s27, 256 }
  0x2a   :  { %v2834_v13 = vpack.c.bf16 %v99_v8, %v96_v4  ;;  %v2836_v14 = vpack.c.bf16 %v105_v10, %v102_v9  ;;  %v108_v15 = vand.u32 4294901760, %v81_v11  ;;  %v117_v21 = vand.u32 4294901760, %v84_v18  ;;  %v85_v22 = vld [vmem:[#allocation2 + $0x40] sm:$0xff]  ;;  %v87_v26 = vld [vmem:[#allocation2 + $0x50] sm:$0xff]  ;;  %v88_v32 = vld [vmem:[#allocation2 + $0x58] sm:$0xff]  ;;  %p2713_p2 = scmp.ne.s32.totalorder %s1581_s27, %s2712_s28  ;;  %p2718_p4 = scmp.lt.s32.totalorder %s2712_s28, %s2712_s28 }
  0x2b   :  { %v2843_v24 = vsub.f32 %v79_v5, %v102_v9  ;;  %v2845_v25 = vsub.f32 %v80_v6, %v105_v10  ;;  %v120_v30 = vand.u32 4294901760, %v85_v22  ;;  %v123_v31 = vand.u32 4294901760, %v86_v23  ;;  %v89_v39 = vld [vmem:[#allocation2 + $0x60] sm:$0xff]  ;;  %v90_v44 = vld [vmem:[#allocation2 + $0x68] sm:$0xff]  ;;  %v91_v55 = vld [vmem:[#allocation2 + $0x70] sm:$0xff] }
  0x2c   :  { %69 = vperm.xlu0 %2659, %v62_v7   ;;  %2244 = vmatprep.subr.bf16.mxu0 %v2834_v13  ;;  %v2841_v19 = vpack.c.bf16 %v111_v16, %v108_v15  ;;  %v2851_v29 = vpack.c.bf16 %v117_v21, %v114_v20  ;;  %v2859_v35 = vsub.f32 %v81_v11, %v108_v15  ;;  %v126_v36 = vand.u32 4294901760, %v87_v26  ;;  %v92_v63 = vld [vmem:[#allocation2 + $0x78] sm:$0xff]  ;;  %p2719_p5 = por %p2718_p4, %p2717_p3 }
  0x2d   :  { %2246 = vmatpush3.bf16.msra.mxu0 %v2834_v13  ;;  %v213_v27 = vand.u32 4294901760, %v2843_v24  ;;  %v220_v28 = vand.u32 4294901760, %v2845_v25  ;;  %v2861_v37 = vsub.f32 %v82_v12, %v111_v16  ;;  %v129_v38 = vand.u32 4294901760, %v88_v32 }
  0x2e   :  { %2248 = vmatprep.subr.bf16.mxu0 %v2836_v14  ;;  %v227_v42 = vand.u32 4294901760, %v2859_v35  ;;  %v2866_v43 = vpack.c.bf16 %v123_v31, %v120_v30  ;;  %v2870_v46 = vsub.f32 %v78_v3, %v99_v8  ;;  %v2878_v50 = vsub.f32 %v83_v17, %v114_v20  ;;  %p2720_p6 = pnand %p2719_p5, %p2713_p2 }
  0x2f   :  { %v214_v33 = vsub.f32 %v2843_v24, %v213_v27  ;;  %v221_v34 = vsub.f32 %v2845_v25, %v220_v28  ;;  %v234_v47 = vand.u32 4294901760, %v2861_v37  ;;  %v2880_v51 = vsub.f32 %v84_v18, %v117_v21 }
  0x30   :  { %v228_v49 = vsub.f32 %v2859_v35, %v227_v42  ;;  %v132_v52 = vand.u32 4294901760, %v89_v39  ;;  %v135_v54 = vand.u32 4294901760, %v90_v44  ;;  %v241_v57 = vand.u32 4294901760, %v2878_v50 }
  0x31   :  { %2250 = vmatpush3.bf16.msra.mxu0 %v2836_v14  ;;  %v215_v40 = vand.u32 4294901760, %v214_v33  ;;  %v222_v41 = vand.u32 4294901760, %v221_v34  ;;  %v235_v53 = vsub.f32 %v2861_v37, %v234_v47  ;;  %v248_v58 = vand.u32 4294901760, %v2880_v51 }
  0x32   :  { %2252 = vmatprep.subr.bf16.mxu0 %v2841_v19  ;;  %v229_v56 = vand.u32 4294901760, %v228_v49  ;;  %v2889_v59 = vpack.c.bf16 %v129_v38, %v126_v36  ;;  %v199_v60 = vand.u32 4294901760, %v2868_v45  ;;  %v206_v61 = vand.u32 4294901760, %v2870_v46 }
  0x33   :  { %v2873_v48 = vpack.c.bf16 %v222_v41, %v215_v40  ;;  %v236_v62 = vand.u32 4294901760, %v235_v53  ;;  %v242_v0 = vsub.f32 %v2878_v50, %v241_v57  ;;  %v249_v1 = vsub.f32 %v2880_v51, %v248_v58 }
  0x34   :  { %v2899_v2 = vsub.f32 %v85_v22, %v120_v30  ;;  %v2901_v3 = vsub.f32 %v86_v23, %v123_v31  ;;  %v138_v4 = vand.u32 4294901760, %v91_v55  ;;  %v2909_v10 = vpack.c.bf16 %v135_v54, %v132_v52 }
  0x35   :  { %2254 = vmatpush3.bf16.msra.mxu0 %v2841_v19  ;;  %v2903_v5 = vpack.c.bf16 %v236_v62, %v229_v56  ;;  %v243_v6 = vand.u32 4294901760, %v242_v0  ;;  %v250_v7 = vand.u32 4294901760, %v249_v1  ;;  %v141_v11 = vand.u32 4294901760, %v92_v63 }
  0x36   :  { %2256 = vmatprep.subr.bf16.mxu0 %v2851_v29  ;;  %v255_v8 = vand.u32 4294901760, %v2899_v2  ;;  %v262_v9 = vand.u32 4294901760, %v2901_v3  ;;  %v200_v12 = vsub.f32 %v2868_v45, %v199_v60  ;;  %v207_v15 = vsub.f32 %v2870_v46, %v206_v61 }
  0x37   :  { %v2917_v16 = vpack.c.bf16 %v250_v7, %v243_v6  ;;  %v2925_v20 = vsub.f32 %v87_v26, %v126_v36  ;;  %v2927_v21 = vsub.f32 %v88_v32, %v129_v38  ;;  %v2932_v31 = vpack.c.bf16 %v141_v11, %v138_v4 }
  0x38   :  { %v256_v17 = vsub.f32 %v2899_v2, %v255_v8  ;;  %v263_v18 = vsub.f32 %v2901_v3, %v262_v9  ;;  %v201_v33 = vand.u32 4294901760, %v200_v12  ;;  %v208_v34 = vand.u32 4294901760, %v207_v15 }
  0x39   :  { %2258 = vmatpush3.bf16.msra.mxu0 %v2851_v29  ;;  %v3462_v30 = vand.u32 4294901760, %v2925_v20  ;;  %v3461_v40 = vand.u32 4294901760, %v2927_v21  ;;  %v2940_v32 = vsub.f32 %v89_v39, %v132_v52  ;;  %v2942_v36 = vsub.f32 %v90_v44, %v135_v54 }
  0x3a   :  { %2260 = vmatprep.subr.bf16.mxu0 %v2866_v43  ;;  %v257_v22 = vand.u32 4294901760, %v256_v17  ;;  %v264_v23 = vand.u32 4294901760, %v263_v18  ;;  %v2275_v62 = vpack.c.bf16 %v208_v34, %v201_v33  ;;  %v2957_v52 = vsub.f32 %v91_v55, %v138_v4 }
  0x3b   :  { %v270_v26 = vsub.f32 %v2925_v20, %v3462_v30  ;;  %v277_v38 = vsub.f32 %v2927_v21, %v3461_v40  ;;  %v3460_v53 = vand.u32 4294901760, %v2940_v32  ;;  %v3459_v56 = vand.u32 4294901760, %v2942_v36 }
  0x3c   :  { %v2935_v41 = vpack.c.bf16 %v264_v23, %v257_v22  ;;  %v2959_v54 = vsub.f32 %v92_v63, %v141_v11  ;;  %v3458_v12 = vand.u32 4294901760, %v2957_v52  ;;  %v2307_v22 = vpack.c.bf16 %v2870_v46, %v2868_v45 }
  0x3d   :  { %2262 = vmatpush3.bf16.msra.mxu0 %v2866_v43  ;;  %v271_v49 = vand.u32 4294901760, %v270_v26  ;;  %v278_v0 = vand.u32 4294901760, %v277_v38  ;;  %v284_v39 = vsub.f32 %v2940_v32, %v3460_v53  ;;  %v291_v44 = vsub.f32 %v2942_v36, %v3459_v56 }
  0x3e   :  { %2264 = vmatprep.subr.bf16.mxu0 %v2889_v59  ;;  %v3457_v15 = vand.u32 4294901760, %v2959_v54  ;;  %v298_v18 = vsub.f32 %v2957_v52, %v3458_v12  ;;  %v2311_v23 = vpack.c.bf16 %v2845_v25, %v2843_v24  ;;  %v2315_v33 = vpack.c.bf16 %v2861_v37, %v2859_v35 }
  0x3f   :  { %v2295_v1 = vpack.c.bf16 %v278_v0, %v271_v49  ;;  %v285_v6 = vand.u32 4294901760, %v284_v39  ;;  %v292_v7 = vand.u32 4294901760, %v291_v44  ;;  %v2319_v34 = vpack.c.bf16 %v2880_v51, %v2878_v50 }
  0x40   :  { %v305_v55 = vsub.f32 %v2959_v54, %v3457_v15  ;;  %v299_v63 = vand.u32 4294901760, %v298_v18  ;;  %v2323_v26 = vpack.c.bf16 %v2901_v3, %v2899_v2  ;;  %v2327_v38 = vpack.c.bf16 %v2927_v21, %v2925_v20 }
  0x41   :  { %2266 = vmatpush3.bf16.msra.mxu0 %v2889_v59  ;;  %v2299_v17 = vpack.c.bf16 %v292_v7, %v285_v6  ;;  %v2331_v49 = vpack.c.bf16 %v2942_v36, %v2940_v32  ;;  %v2335_v0 = vpack.c.bf16 %v2959_v54, %v2957_v52  ;;  %v63_v39 = vlaneseq }
  0x42   :  { %2268 = vmatprep.subr.bf16.mxu0 %v2909_v10  ;;  %v306_v4 = vand.u32 4294901760, %v305_v55  ;;  %v2745_v7 = vmov 0.0   ;;  %v2746_v30 = vmov 1.0   ;;  %v2379_v45 = vpack.c.bf16 %v234_v47, %v227_v42 }
  0x43   :  { %v2986_v44 = vand.u32 127, %v63_v39  ;;  %v2383_v24 = vpack.c.bf16 %v248_v58, %v241_v57  ;;  %v2387_v25 = vpack.c.bf16 %v262_v9, %v255_v8  ;;  %v3476_v37 = vand.u32 4294901760, %v2940_v32 }
  0x44   :  { %v2303_v11 = vpack.c.bf16 %v306_v4, %v299_v63  ;;  %v3477_v42 = vand.u32 4294901760, %v2942_v36  ;;  %v3478_v47 = vand.u32 4294901760, %v2957_v52  ;;  %v3479_v50 = vand.u32 4294901760, %v2959_v54 }
  0x45   :  { %2270 = vmatpush3.bf16.msra.mxu0 %v2909_v10  ;;  %vm779_vm2 = vcmp.lt.s32.totalorder %v2986_v44, 32 }
  0x46   :  { %2272 = vmatprep.subr.bf16.mxu0 %v2932_v31  ;;  %v2395_v46 = vpack.c.bf16 %v3477_v42, %v3476_v37  ;;  %v2399_v51 = vpack.c.bf16 %v3479_v50, %v3478_v47  ;;  %v872_v37 = vld [vmem:[#allocation5 + $0x30] sm:$0xff]  ;;  %v873_v42 = vld [vmem:[#allocation5 + $0x38] sm:$0xff] }
  0x47   :  { %v911_v47 = vand.u32 4294901760, %v873_v42 }
  0x49   :  { %2274 = vmatpush3.bf16.msra.mxu0 %v2932_v31 }
  0x4a   :  { %2276 = vmatprep.subr.bf16.mxu0 %v2275_v62 }
  0xa7   :  { %v2988_v6 = vpop.permute.xlu0 %66 }
  0xa8   :  { %vm71_vm0 = vcmp.eq.s32.totalorder %v2986_v44, %v2988_v6  ;;  %v866_v6 = vld [vmem:[#allocation5] sm:$0xff] }
  0xa9   :  { %v1593_v18 = vsel %vm71_vm0, 1.0, %v2745_v7 }
  0xaa   :  { %v177_v55 = vsub.f32 %v1593_v18, %v1593_v18 }
  0xab   :  { %v2996_v63 = vpop.permute.xlu0 %69 }
  0xac   :  { %vm72_vm1 = vcmp.eq.s32.totalorder %v2986_v44, %v2996_v63  ;;  %v178_v4 = vand.u32 4294901760, %v177_v55 }
  0xad   :  { %v1594_v39 = vsel %vm72_vm1, 1.0, %v2745_v7 }
  0xae   :  { %v3004_v15 = vsub.f32 %v1594_v39, %v1594_v39  ;;  %v179_v12 = vsub.f32 %v177_v55, %v178_v4  ;;  %v868_v39 = vld [vmem:[#allocation5 + $0x10] sm:$0xff] }
  0xb0   :  { %v180_v56 = vand.u32 4294901760, %v179_v12  ;;  %v188_v53 = vand.u32 4294901760, %v3004_v15 }
  0xb2   :  { %1855 = vmatprep.mubr.f32.mxu0 %v180_v56  ;;  %v189_v18 = vsub.f32 %v3004_v15, %v188_v53 }
  0xb4   :  { %v190_v40 = vand.u32 4294901760, %v189_v18  ;;  %v869_v18 = vld [vmem:[#allocation5 + $0x18] sm:$0xff] }
  0xb6   :  { %1856 = vmatmul.mubr.f32.vlgmr.msra.gmra.mrb[0].mxu0 %v190_v40 }
  0xb7   :  { %2278 = vmatpush3.bf16.msra.mxu0 %v2275_v62  ;;  %1890 = vmatprep.mubr.msk.f32.mxu0 %vm71_vm0, %v2746_v30  ;;  %v1603_v62 = vld [vmem:[%s3451_s4] ss:$0 sm:$0xff] }
  0xb8   :  { %2280 = vmatprep.subr.bf16.mxu0 %v2873_v48 }
  0xbb   :  { %2282 = vmatpush3.bf16.msra.mxu0 %v2873_v48  ;;  %v2371_v48 = vpack.c.bf16 %v206_v61, %v199_v60  ;;  %v1601_v60 = vsel %vm779_vm2, 1.0, %v2745_v7  ;;  %v867_v7 = vld [vmem:[#allocation5 + $0x8] sm:$0xff] }
  0xbc   :  { %2284 = vmatprep.subr.bf16.mxu0 %v2903_v5  ;;  %v893_v63 = vand.u32 4294901760, %v867_v7 }
  0xbf   :  { %2286 = vmatpush3.bf16.msra.mxu0 %v2903_v5  ;;  %v2375_v5 = vpack.c.bf16 %v220_v28, %v213_v27  ;;  %v3474_v27 = vand.u32 4294901760, %v2925_v20  ;;  %v3475_v28 = vand.u32 4294901760, %v2927_v21 }
  0xc0   :  { %2288 = vmatprep.subr.bf16.mxu0 %v2917_v16 }
  0xc1   :  { %v2391_v35 = vpack.c.bf16 %v3475_v28, %v3474_v27 }
  0xc3   :  { %2290 = vmatpush3.bf16.msra.mxu0 %v2917_v16 }
  0xc4   :  { %2292 = vmatprep.subr.bf16.mxu0 %v2935_v41 }
  0xc7   :  { %2294 = vmatpush3.bf16.msra.mxu0 %v2935_v41 }
  0xc8   :  { %2296 = vmatprep.subr.bf16.mxu0 %v2295_v1 }
  0xcb   :  { %2298 = vmatpush3.bf16.msra.mxu0 %v2295_v1 }
  0xcc   :  { %2300 = vmatprep.subr.bf16.mxu0 %v2299_v17 }
  0xcf   :  { %2302 = vmatpush3.bf16.msra.mxu0 %v2299_v17 }
  0xd0   :  { %2304 = vmatprep.subr.bf16.mxu0 %v2303_v11 }
  0xd3   :  { %2306 = vmatpush3.bf16.msra.mxu0 %v2303_v11 }
  0xd4   :  { %2308 = vmatprep.subr.bf16.mxu0 %v2307_v22 }
  0xd6   :  { %1891 = vmatmul.mubr.msk.f32.vlgmr.msra.gmra.mrb[0].mxu0 %vm72_vm1, %v2746_v30 }
  0xd7   :  { %2310 = vmatpush3.bf16.msra.mxu0 %v2307_v22  ;;  %1925 = vmatprep.mubr.f32.mxu0 %v177_v55  ;;  %v890_v55 = vand.u32 4294901760, %v866_v6 }
  0xd8   :  { %2312 = vmatprep.subr.bf16.mxu0 %v2311_v23 }
  0xdb   :  { %2314 = vmatpush3.bf16.msra.mxu0 %v2311_v23 }
  0xdc   :  { %2316 = vmatprep.subr.bf16.mxu0 %v2315_v33 }
  0xdf   :  { %2318 = vmatpush3.bf16.msra.mxu0 %v2315_v33 }
  0xe0   :  { %2320 = vmatprep.subr.bf16.mxu0 %v2319_v34 }
  0xe3   :  { %2322 = vmatpush3.bf16.msra.mxu0 %v2319_v34 }
  0xe4   :  { %2324 = vmatprep.subr.bf16.mxu0 %v2323_v26 }
  0xe7   :  { %2326 = vmatpush3.bf16.msra.mxu0 %v2323_v26 }
  0xe8   :  { %2328 = vmatprep.subr.bf16.mxu0 %v2327_v38 }
  0xeb   :  { %2330 = vmatpush3.bf16.msra.mxu0 %v2327_v38 }
  0xec   :  { %2332 = vmatprep.subr.bf16.mxu0 %v2331_v49 }
  0xef   :  { %2334 = vmatpush3.bf16.msra.mxu0 %v2331_v49 }
  0xf0   :  { %2336 = vmatprep.subr.bf16.mxu0 %v2335_v0 }
  0xf3   :  { %2338 = vmatpush3.bf16.msra.mxu0 %v2335_v0 }
  0xf4   :  { %2340 = vmatprep.subr.bf16.mxu0 %v2834_v13 }
  0xf6   :  { %1926 = vmatmul.mubr.f32.vlgmr.msra.gmra.mrb[0].mxu0 %v3004_v15 }
  0xf7   :  { %2342 = vmatpush3.bf16.msra.mxu0 %v2834_v13  ;;  %1960 = vmatprep.mubr.f32.mxu0 %v178_v4  ;;  %v3125_v4 = vpack.c.bf16 %v893_v63, %v890_v55 }
  0xf8   :  { %2344 = vmatprep.subr.bf16.mxu0 %v2836_v14 }
  0xf9   :  { %2436 = vmatprep.subr.bf16.mxu1 %v3125_v4 }
  0xfa   :  { %2438 = vmatpush3.bf16.msra.mxu1 %v3125_v4 }
  0xfb   :  { %2346 = vmatpush3.bf16.msra.mxu0 %v2836_v14 }
  0xfc   :  { %2348 = vmatprep.subr.bf16.mxu0 %v2841_v19 }
  0xff   :  { %2350 = vmatpush3.bf16.msra.mxu0 %v2841_v19 }
 0x100   :  { %2352 = vmatprep.subr.bf16.mxu0 %v2851_v29 }
 0x103   :  { %2354 = vmatpush3.bf16.msra.mxu0 %v2851_v29 }
 0x104   :  { %2356 = vmatprep.subr.bf16.mxu0 %v2866_v43 }
 0x107   :  { %2358 = vmatpush3.bf16.msra.mxu0 %v2866_v43 }
 0x108   :  { %2360 = vmatprep.subr.bf16.mxu0 %v2889_v59 }
 0x10b   :  { %2362 = vmatpush3.bf16.msra.mxu0 %v2889_v59 }
 0x10c   :  { %2364 = vmatprep.subr.bf16.mxu0 %v2909_v10 }
 0x10f   :  { %2366 = vmatpush3.bf16.msra.mxu0 %v2909_v10 }
 0x110   :  { %2368 = vmatprep.subr.bf16.mxu0 %v2932_v31 }
 0x113   :  { %2370 = vmatpush3.bf16.msra.mxu0 %v2932_v31 }
 0x114   :  { %2372 = vmatprep.subr.bf16.mxu0 %v2371_v48 }
 0x116   :  { %1961 = vmatmul.mubr.f32.vlgmr.msra.gmra.mrb[0].mxu0 %v188_v53  ;;  %v1602_v53 = vld [vmem:[%s3450_s3] ss:$0 sm:$0xff] }
 0x117   :  { %2374 = vmatpush3.bf16.msra.mxu0 %v2371_v48  ;;  %1995 = vmatprep.mubr.msk.f32.mxu0 %vm71_vm0, %v2746_v30  ;;  %v896_v48 = vand.u32 4294901760, %v868_v39 }
 0x118   :  { %2376 = vmatprep.subr.bf16.mxu0 %v2375_v5 }
 0x11b   :  { %2378 = vmatpush3.bf16.msra.mxu0 %v2375_v5  ;;  %v899_v5 = vand.u32 4294901760, %v869_v18 }
 0x11c   :  { %2380 = vmatprep.subr.bf16.mxu0 %v2379_v45 }
 0x11f   :  { %2382 = vmatpush3.bf16.msra.mxu0 %v2379_v45  ;;  %v3129_v45 = vpack.c.bf16 %v899_v5, %v896_v48 }
 0x120   :  { %2384 = vmatprep.subr.bf16.mxu0 %v2383_v24 }
 0x121   :  { %2440 = vmatprep.subr.bf16.mxu1 %v3129_v45 }
 0x122   :  { %2442 = vmatpush3.bf16.msra.mxu1 %v3129_v45 }
 0x123   :  { %2386 = vmatpush3.bf16.msra.mxu0 %v2383_v24  ;;  %v870_v24 = vld [vmem:[#allocation5 + $0x20] sm:$0xff] }
 0x124   :  { %2388 = vmatprep.subr.bf16.mxu0 %v2387_v25  ;;  %v902_v27 = vand.u32 4294901760, %v870_v24 }
 0x127   :  { %2390 = vmatpush3.bf16.msra.mxu0 %v2387_v25  ;;  %v871_v25 = vld [vmem:[#allocation5 + $0x28] sm:$0xff] }
 0x128   :  { %2392 = vmatprep.subr.bf16.mxu0 %v2391_v35  ;;  %v905_v28 = vand.u32 4294901760, %v871_v25 }
 0x12b   :  { %2394 = vmatpush3.bf16.msra.mxu0 %v2391_v35  ;;  %v3133_v35 = vpack.c.bf16 %v905_v28, %v902_v27 }
 0x12c   :  { %2396 = vmatprep.subr.bf16.mxu0 %v2395_v46 }
 0x12d   :  { %2444 = vmatprep.subr.bf16.mxu1 %v3133_v35 }
 0x12e   :  { %2446 = vmatpush3.bf16.msra.mxu1 %v3133_v35 }
 0x12f   :  { %2398 = vmatpush3.bf16.msra.mxu0 %v2395_v46  ;;  %v908_v46 = vand.u32 4294901760, %v872_v37 }
 0x130   :  { %2400 = vmatprep.subr.bf16.mxu0 %v2399_v51 }
 0x131   :  { %v3137_v50 = vpack.c.bf16 %v911_v47, %v908_v46 }
 0x133   :  { %2402 = vmatpush3.bf16.msra.mxu0 %v2399_v51  ;;  %v3139_v51 = vld [vmem:[#allocation5 + $0x40] sm:$0xff]  ;;  %2448 = vmatprep.subr.bf16.mxu1 %v3137_v50 }
 0x134   :  { %2404 = vmatprep.subr.bf16.mxu0 %v2834_v13  ;;  %2450 = vmatpush3.bf16.msra.mxu1 %v3137_v50 }
 0x136   :  { %1996 = vmatmul.mubr.msk.f32.vlgmr.msra.gmra.mrb[0].mxu0 %vm72_vm1, %v2746_v30 }
 0x137   :  { %2406 = vmatpush3.bf16.msra.mxu0 %v2834_v13  ;;  %2030 = vmatprep.mubr.msk.f32.mxu0 %vm71_vm0, %v2746_v30  ;;  %v93_v13 = vld [vmem:[%s3449_s2] sm:$0xff] }
 0x138   :  { %2408 = vmatprep.subr.bf16.mxu0 %v2836_v14 }
 0x13b   :  { %2410 = vmatpush3.bf16.msra.mxu0 %v2836_v14 }
 0x13c   :  { %2412 = vmatprep.subr.bf16.mxu0 %v2841_v19 }
 0x13f   :  { %2414 = vmatpush3.bf16.msra.mxu0 %v2841_v19 }
 0x140   :  { %2416 = vmatprep.subr.bf16.mxu0 %v2851_v29 }
 0x143   :  { %2418 = vmatpush3.bf16.msra.mxu0 %v2851_v29 }
 0x144   :  { %2420 = vmatprep.subr.bf16.mxu0 %v2866_v43 }
 0x147   :  { %2422 = vmatpush3.bf16.msra.mxu0 %v2866_v43  ;;  %v94_v43 = vld [vmem:[%s3449_s2 + $0x8] sm:$0xff] }
 0x148   :  { %2424 = vmatprep.subr.bf16.mxu0 %v2889_v59 }
 0x14b   :  { %2426 = vmatpush3.bf16.msra.mxu0 %v2889_v59 }
 0x14c   :  { %2428 = vmatprep.subr.bf16.mxu0 %v2909_v10 }
 0x14f   :  { %2430 = vmatpush3.bf16.msra.mxu0 %v2909_v10 }
 0x150   :  { %2432 = vmatprep.subr.bf16.mxu0 %v2932_v31 }
 0x153   :  { %2434 = vmatpush3.bf16.msra.mxu0 %v2932_v31 }
 0x156   :  { %2031 = vmatmul.mubr.msk.f32.vlgmr.msra.gmra.mrb[0].mxu0 %vm72_vm1, %v2746_v30 }
 0x229   :  { %v2032_v14 = vpop.f32.mrb[0].mxu0 }
 0x22a   :  { %v769_v19 = vpop.f32.mrb[1].mxu0  ;;  %v2627_v57 = vadd.f32 %v2032_v14, %v94_v43  ;;  %v914_v14 = vand.u32 4294901760, %v3139_v51  ;;  %v3149_v43 = vld [vmem:[#allocation5 + $0x50] sm:$0xff] }
 0x22b   :  { %v2628_v29 = vadd.f32 %v769_v19, %v93_v13  ;;  %v3141_v13 = vld [vmem:[#allocation5 + $0x48] sm:$0xff] }
 0x22c   :  { %v917_v19 = vand.u32 4294901760, %v3141_v13 }
 0x22d   :  { %782 = vadd.xlane.f32.xlu1 %v2628_v29 }
 0x231   :  { %784 = vadd.xlane.f32.xlu1 %v2627_v57 }
 0x2ba   :  { %v783_v58 = vpop.xlane.xlu1 %782 }
 0x2bb   :  { %v786_v59 = vmul.f32 0.03125, %v783_v58  ;;  %v920_v58 = vand.u32 4294901760, %v3149_v43 }
 0x2bd   :  { %v788_v61 = vsub.f32 %v2628_v29, %v786_v59  ;;  %v3147_v29 = vpack.c.bf16 %v917_v19, %v914_v14 }
 0x2be   :  { %v785_v2 = vpop.xlane.xlu1 %784 }
 0x2bf   :  { %v787_v3 = vmul.f32 0.03125, %v785_v2  ;;  %v790_v8 = vmul.f32 %v1601_v60, %v788_v61  ;;  %2452 = vmatprep.subr.bf16.mxu1 %v3147_v29  ;;  %v3161_v2 = vld [vmem:[#allocation5 + $0x70] sm:$0xff] }
 0x2c0   :  { %2454 = vmatpush3.bf16.msra.mxu1 %v3147_v29 }
 0x2c1   :  { %v789_v9 = vsub.f32 %v2627_v57, %v787_v3  ;;  %v792_v10 = vmul.f32 %v790_v8, %v790_v8  ;;  %v3151_v57 = vld [vmem:[#allocation5 + $0x58] sm:$0xff] }
 0x2c2   :  { %v923_v59 = vand.u32 4294901760, %v3151_v57 }
 0x2c3   :  { %794 = vadd.xlane.f32.xlu0 %v792_v10  ;;  %v791_v16 = vmul.f32 %v1601_v60, %v789_v9  ;;  %v3167_v10 = vld [vmem:[#allocation5 + $0x78] sm:$0xff] }
 0x2c4   :  { %v3163_v3 = vpack.c.bf16 %v923_v59, %v920_v58 }
 0x2c5   :  { %v793_v20 = vmul.f32 %v791_v16, %v791_v16  ;;  %v932_v16 = vand.u32 4294901760, %v3161_v2 }
 0x2c6   :  { %2456 = vmatprep.subr.bf16.mxu1 %v3163_v3 }
 0x2c7   :  { %796 = vadd.xlane.f32.xlu1 %v793_v20  ;;  %v935_v20 = vand.u32 4294901760, %v3167_v10  ;;  %2458 = vmatpush3.bf16.msra.mxu1 %v3163_v3 }
 0x350   :  { %v795_v21 = vpop.xlane.xlu0 %794 }
 0x351   :  { %v798_v30 = vmul.f32 0.03125, %v795_v21 }
 0x353   :  { %v800_v31 = vadd.f32 1e-05, %v798_v30  ;;  %v3184_v30 = vpack.c.bf16 %v935_v20, %v932_v16 }
 0x354   :  { %v797_v40 = vpop.xlane.xlu1 %796 }
 0x355   :  { %2660 = vrsqrt.f32 %v800_v31  ;;  %v799_v41 = vmul.f32 0.03125, %v797_v40  ;;  %v3186_v31 = vsub.f32 %v866_v6, %v890_v55  ;;  %v3188_v40 = vsub.f32 %v867_v7, %v893_v63 }
 0x356   :  { %v3230_v55 = vsub.f32 %v872_v37, %v908_v46  ;;  %v3232_v63 = vsub.f32 %v873_v42, %v911_v47 }
 0x357   :  { %v801_v32 = vadd.f32 1e-05, %v799_v41  ;;  %v993_v41 = vand.u32 4294901760, %v3186_v31 }
 0x359   :  { %2662 = vrsqrt.f32 %v801_v32  ;;  %v1000_v32 = vand.u32 4294901760, %v3188_v40 }
 0x35f   :  { %v2661_v36 = vpop.eup %2660 }
 0x360   :  { %v804_v56 = vmul.f32 %v2661_v36, %v788_v61  ;;  %v3159_v61 = vld [vmem:[#allocation5 + $0x68] sm:$0xff]  ;;  %v994_v36 = vsub.f32 %v3186_v31, %v993_v41 }
 0x362   :  { %v813_v52 = vmul.f32 %v1602_v53, %v804_v56  ;;  %v3200_v56 = vsub.f32 %v868_v39, %v896_v48  ;;  %v3472_v48 = vand.u32 4294901760, %v3230_v55 }
 0x363   :  { %v2663_v54 = vpop.eup %2662 }
 0x364   :  { %v822_v1 = vadd.f32 %v1603_v62, %v813_v52  ;;  %v805_v12 = vmul.f32 %v2663_v54, %v789_v9  ;;  %v929_v9 = vand.u32 4294901760, %v3159_v61  ;;  %v995_v52 = vand.u32 4294901760, %v994_v36 }
 0x366   :  { %824 = vadd.xlane.f32.xlu1 %v822_v1  ;;  %v814_v15 = vmul.f32 %v1602_v53, %v805_v12  ;;  %v1001_v53 = vsub.f32 %v3188_v40, %v1000_v32 }
 0x368   :  { %v823_v17 = vadd.f32 %v1603_v62, %v814_v15  ;;  %v3202_v62 = vsub.f32 %v869_v18, %v899_v5  ;;  %v1002_v54 = vand.u32 4294901760, %v1001_v53  ;;  %v3471_v5 = vand.u32 4294901760, %v3232_v63 }
 0x36a   :  { %826 = vadd.xlane.f32.xlu1 %v823_v17  ;;  %v1014_v12 = vand.u32 4294901760, %v3202_v62  ;;  %v3207_v15 = vpack.c.bf16 %v1002_v54, %v995_v52  ;;  %v1043_v37 = vsub.f32 %v3232_v63, %v3471_v5 }
 0x36c   :  { %v1044_v36 = vand.u32 4294901760, %v1043_v37 }
 0x3f3   :  { %v825_v11 = vpop.xlane.xlu1 %824 }
 0x3f4   :  { %v828_v22 = vmul.f32 0.03125, %v825_v11  ;;  %v1015_v11 = vsub.f32 %v3202_v62, %v1014_v12 }
 0x3f6   :  { %v3119_v23 = vsub.f32 %v822_v1, %v828_v22  ;;  %v1007_v1 = vand.u32 4294901760, %v3200_v56  ;;  %v3215_v22 = vsub.f32 %v870_v24, %v902_v27  ;;  %v3242_v27 = vsub.f32 %v3139_v51, %v914_v14 }
 0x3f7   :  { %v827_v33 = vpop.xlane.xlu1 %826  ;;  %v3262_v14 = vsub.f32 %v3151_v57, %v923_v59 }
 0x3f8   :  { %v829_v34 = vmul.f32 0.03125, %v827_v33  ;;  %v832_v26 = vmul.f32 %v1601_v60, %v3119_v23  ;;  %v3217_v33 = vsub.f32 %v871_v25, %v905_v28  ;;  %v1036_v25 = vsub.f32 %v3230_v55, %v3472_v48 }
 0x3f9   :  { %v3245_v28 = vsub.f32 %v3141_v13, %v917_v19  ;;  %v3470_v46 = vand.u32 4294901760, %v3242_v27  ;;  %v3259_v13 = vsub.f32 %v3149_v43, %v920_v58  ;;  %v3284_v58 = vsub.f32 %v3159_v61, %v929_v9 }
 0x3fa   :  { %v3122_v38 = vsub.f32 %v823_v17, %v829_v34  ;;  %v834_v49 = vmul.f32 %v832_v26, %v832_v26  ;;  %v1008_v17 = vsub.f32 %v3200_v56, %v1007_v1  ;;  %v1016_v26 = vand.u32 4294901760, %v1015_v11 }
 0x3fb   :  { %v1037_v42 = vand.u32 4294901760, %v1036_v25  ;;  %v3469_v47 = vand.u32 4294901760, %v3245_v28  ;;  %v1050_v53 = vsub.f32 %v3242_v27, %v3470_v46  ;;  %v3467_v11 = vand.u32 4294901760, %v3262_v14 }
 0x3fc   :  { %836 = vadd.xlane.f32.xlu1 %v834_v49  ;;  %v833_v0 = vmul.f32 %v1601_v60, %v3122_v38  ;;  %v3157_v60 = vld [vmem:[#allocation5 + $0x60] sm:$0xff]  ;;  %v1009_v34 = vand.u32 4294901760, %v1008_v17  ;;  %v1021_v49 = vand.u32 4294901760, %v3215_v22  ;;  %v3468_v17 = vand.u32 4294901760, %v3259_v13 }
 0x3fd   :  { %v926_v8 = vand.u32 4294901760, %v3157_v60  ;;  %v1057_v51 = vsub.f32 %v3245_v28, %v3469_v47  ;;  %v3264_v19 = vpack.c.bf16 %v1044_v36, %v1037_v42  ;;  %v1051_v52 = vand.u32 4294901760, %v1050_v53 }
 0x3fe   :  { %v835_v44 = vmul.f32 %v833_v0, %v833_v0  ;;  %v3473_v0 = vand.u32 4294901760, %v3217_v33  ;;  %v1022_v6 = vsub.f32 %v3215_v22, %v1021_v49  ;;  %v1071_v43 = vsub.f32 %v3262_v14, %v3467_v11 }
 0x3ff   :  { %v3176_v21 = vpack.c.bf16 %v929_v9, %v926_v8  ;;  %v1058_v54 = vand.u32 4294901760, %v1057_v51  ;;  %v3279_v57 = vsub.f32 %v3157_v60, %v926_v8  ;;  %v3296_v60 = vsub.f32 %v3161_v2, %v932_v16 }
 0x400   :  { %838 = vadd.xlane.f32.xlu1 %v835_v44  ;;  %v3222_v44 = vpack.c.bf16 %v1016_v26, %v1009_v34  ;;  %v1029_v7 = vsub.f32 %v3217_v33, %v3473_v0  ;;  %v1023_v39 = vand.u32 4294901760, %v1022_v6  ;;  %v1064_v26 = vsub.f32 %v3259_v13, %v3468_v17 }
 0x401   :  { %2460 = vmatprep.subr.bf16.mxu1 %v3176_v21  ;;  %v3268_v34 = vpack.c.bf16 %v1058_v54, %v1051_v52  ;;  %v1072_v6 = vand.u32 4294901760, %v1071_v43  ;;  %v3301_v61 = vsub.f32 %v3167_v10, %v935_v20  ;;  %v3464_v37 = vand.u32 4294901760, %v3296_v60 }
 0x402   :  { %2462 = vmatpush3.bf16.msra.mxu1 %v3176_v21  ;;  %v1030_v18 = vand.u32 4294901760, %v1029_v7  ;;  %v1065_v59 = vand.u32 4294901760, %v1064_v26  ;;  %v3466_v7 = vand.u32 4294901760, %v3279_v57  ;;  %v2499_v52 = vpack.c.bf16 %v3188_v40, %v3186_v31 }
 0x403   :  { %2464 = vmatprep.subr.bf16.mxu1 %v3184_v30  ;;  %v3463_v42 = vand.u32 4294901760, %v3301_v61  ;;  %v1092_v2 = vsub.f32 %v3296_v60, %v3464_v37  ;;  %v2503_v54 = vpack.c.bf16 %v3202_v62, %v3200_v56  ;;  %v2507_v26 = vpack.c.bf16 %v3217_v33, %v3215_v22  ;;  %v1604_v37 = vld [vmem:[%s3452_s5] ss:$0 sm:$0xff] }
 0x404   :  { %v3236_v24 = vpack.c.bf16 %v1030_v18, %v1023_v39  ;;  %v3465_v39 = vand.u32 4294901760, %v3284_v58  ;;  %v3288_v18 = vpack.c.bf16 %v1072_v6, %v1065_v59  ;;  %v1078_v25 = vsub.f32 %v3279_v57, %v3466_v7  ;;  %v1605_v7 = vld [vmem:[%s3453_s6] ss:$0 sm:$0xff] }
 0x405   :  { %v1099_v16 = vsub.f32 %v3301_v61, %v3463_v42  ;;  %v1093_v20 = vand.u32 4294901760, %v1092_v2  ;;  %v2511_v43 = vpack.c.bf16 %v3232_v63, %v3230_v55  ;;  %v2515_v59 = vpack.c.bf16 %v3245_v28, %v3242_v27 }
 0x406   :  { %2466 = vmatpush3.bf16.msra.mxu1 %v3184_v30  ;;  %v1085_v8 = vsub.f32 %v3284_v58, %v3465_v39  ;;  %v1079_v9 = vand.u32 4294901760, %v1078_v25  ;;  %v2519_v6 = vpack.c.bf16 %v3262_v14, %v3259_v13  ;;  %v2523_v25 = vpack.c.bf16 %v3284_v58, %v3279_v57 }
 0x407   :  { %2468 = vmatprep.subr.bf16.mxu1 %v3207_v15  ;;  %v1100_v53 = vand.u32 4294901760, %v1099_v16  ;;  %v3480_v31 = vand.u32 4294901760, %v3217_v33  ;;  %v3481_v40 = vand.u32 4294901760, %v3230_v55  ;;  %v3483_v56 = vand.u32 4294901760, %v3242_v27 }
 0x408   :  { %v1086_v36 = vand.u32 4294901760, %v1085_v8  ;;  %v3330_v8 = vpack.c.bf16 %v3301_v61, %v3296_v60  ;;  %v3484_v62 = vand.u32 4294901760, %v3245_v28  ;;  %v3486_v22 = vand.u32 4294901760, %v3262_v14 }
 0x409   :  { %v2495_v51 = vpack.c.bf16 %v1100_v53, %v1093_v20 }
 0x40a   :  { %v2491_v10 = vpack.c.bf16 %v1086_v36, %v1079_v9 }
 0x489   :  { %v837_v9 = vpop.xlane.xlu1 %836 }
 0x48a   :  { %v840_v36 = vmul.f32 0.03125, %v837_v9 }
 0x48c   :  { %v842_v2 = vadd.f32 1e-05, %v840_v36 }
 0x48d   :  { %v839_v16 = vpop.xlane.xlu1 %838 }
 0x48e   :  { %2664 = vrsqrt.f32 %v842_v2  ;;  %v841_v20 = vmul.f32 0.03125, %v839_v16 }
 0x490   :  { %v843_v53 = vadd.f32 1e-05, %v841_v20 }
 0x492   :  { %2666 = vrsqrt.f32 %v843_v53 }
 0x498   :  { %v2665_v42 = vpop.eup %2664 }
 0x499   :  { %v846_v39 = vmul.f32 %v2665_v42, %v3119_v23 }
 0x49b   :  { %v855_v11 = vmul.f32 %v1604_v37, %v846_v39 }
 0x49c   :  { %v2667_v17 = vpop.eup %2666 }
 0x49d   :  { %v847_v9 = vmul.f32 %v2667_v17, %v3122_v38  ;;  %v864_v36 = vadd.f32 %v1605_v7, %v855_v11  ;;  %v2563_v38 = vpack.c.bf16 %v1000_v32, %v993_v41  ;;  %v3482_v41 = vand.u32 4294901760, %v3232_v63 }
 0x49e   :  { %v3489_v63 = vand.u32 4294901760, %v3296_v60 }
 0x49f   :  { %v856_v2 = vmul.f32 %v1604_v37, %v847_v9  ;;  %v3340_v16 = vand.u32 4294901760, %v864_v36  ;;  %v2575_v32 = vpack.c.bf16 %v3482_v41, %v3481_v40 }
 0x4a1   :  { %v865_v20 = vadd.f32 %v1605_v7, %v856_v2  ;;  %v971_v53 = vsub.f32 %v864_v36, %v3340_v16 }
 0x4a3   :  { %v972_v47 = vand.u32 4294901760, %v971_v53  ;;  %v3343_v46 = vand.u32 4294901760, %v865_v20 }
 0x4a5   :  { %v973_v5 = vsub.f32 %v971_v53, %v972_v47  ;;  %v981_v23 = vsub.f32 %v865_v20, %v3343_v46 }
 0x4a7   :  { %v974_v42 = vand.u32 4294901760, %v973_v5  ;;  %v982_v48 = vand.u32 4294901760, %v981_v23 }
 0x4a9   :  { %2065 = vmatprep.mubr.f32.mxu1 %v974_v42  ;;  %v983_v39 = vsub.f32 %v981_v23, %v982_v48 }
 0x4ab   :  { %v984_v0 = vand.u32 4294901760, %v983_v39 }
 0x4ad   :  { %2066 = vmatmul.mubr.f32.vlgmr.msra.gmra.mrb[0].mxu1 %v984_v0  ;;  %v2571_v0 = vpack.c.bf16 %v3480_v31, %v1021_v49  ;;  %v3487_v49 = vand.u32 4294901760, %v3279_v57 }
 0x4ae   :  { %2470 = vmatpush3.bf16.msra.mxu1 %v3207_v15  ;;  %2100 = vmatprep.mubr.f32.mxu1 %v3340_v16  ;;  %v2567_v15 = vpack.c.bf16 %v1014_v12, %v1007_v1  ;;  %v2579_v1 = vpack.c.bf16 %v3484_v62, %v3483_v56  ;;  %v3485_v12 = vand.u32 4294901760, %v3259_v13 }
 0x4af   :  { %2472 = vmatprep.subr.bf16.mxu1 %v3222_v44 }
 0x4b0   :  { %v2583_v33 = vpack.c.bf16 %v3486_v22, %v3485_v12 }
 0x4b2   :  { %2474 = vmatpush3.bf16.msra.mxu1 %v3222_v44  ;;  %v3488_v44 = vand.u32 4294901760, %v3284_v58 }
 0x4b3   :  { %2476 = vmatprep.subr.bf16.mxu1 %v3236_v24 }
 0x4b4   :  { %v2587_v55 = vpack.c.bf16 %v3488_v44, %v3487_v49 }
 0x4b6   :  { %2478 = vmatpush3.bf16.msra.mxu1 %v3236_v24 }
 0x4b7   :  { %2480 = vmatprep.subr.bf16.mxu1 %v3264_v19 }
 0x4ba   :  { %2482 = vmatpush3.bf16.msra.mxu1 %v3264_v19 }
 0x4bb   :  { %2484 = vmatprep.subr.bf16.mxu1 %v3268_v34 }
 0x4be   :  { %2486 = vmatpush3.bf16.msra.mxu1 %v3268_v34 }
 0x4bf   :  { %2488 = vmatprep.subr.bf16.mxu1 %v3288_v18 }
 0x4c2   :  { %2490 = vmatpush3.bf16.msra.mxu1 %v3288_v18 }
 0x4c3   :  { %2492 = vmatprep.subr.bf16.mxu1 %v2491_v10 }
 0x4c6   :  { %2494 = vmatpush3.bf16.msra.mxu1 %v2491_v10 }
 0x4c7   :  { %2496 = vmatprep.subr.bf16.mxu1 %v2495_v51 }
 0x4ca   :  { %2498 = vmatpush3.bf16.msra.mxu1 %v2495_v51 }
 0x4cb   :  { %2500 = vmatprep.subr.bf16.mxu1 %v2499_v52 }
 0x4cd   :  { %2101 = vmatmul.mubr.f32.vlgmr.msra.gmra.mrb[0].mxu1 %v3343_v46 }
 0x4ce   :  { %2502 = vmatpush3.bf16.msra.mxu1 %v2499_v52  ;;  %2135 = vmatprep.mubr.f32.mxu1 %v971_v53 }
 0x4cf   :  { %2504 = vmatprep.subr.bf16.mxu1 %v2503_v54 }
 0x4d2   :  { %2506 = vmatpush3.bf16.msra.mxu1 %v2503_v54 }
 0x4d3   :  { %2508 = vmatprep.subr.bf16.mxu1 %v2507_v26 }
 0x4d6   :  { %2510 = vmatpush3.bf16.msra.mxu1 %v2507_v26 }
 0x4d7   :  { %2512 = vmatprep.subr.bf16.mxu1 %v2511_v43 }
 0x4da   :  { %2514 = vmatpush3.bf16.msra.mxu1 %v2511_v43 }
 0x4db   :  { %2516 = vmatprep.subr.bf16.mxu1 %v2515_v59 }
 0x4de   :  { %2518 = vmatpush3.bf16.msra.mxu1 %v2515_v59 }
 0x4df   :  { %2520 = vmatprep.subr.bf16.mxu1 %v2519_v6 }
 0x4e2   :  { %2522 = vmatpush3.bf16.msra.mxu1 %v2519_v6 }
 0x4e3   :  { %2524 = vmatprep.subr.bf16.mxu1 %v2523_v25 }
 0x4e6   :  { %2526 = vmatpush3.bf16.msra.mxu1 %v2523_v25 }
 0x4e7   :  { %2528 = vmatprep.subr.bf16.mxu1 %v3330_v8 }
 0x4ea   :  { %2530 = vmatpush3.bf16.msra.mxu1 %v3330_v8 }
 0x4eb   :  { %2532 = vmatprep.subr.bf16.mxu1 %v3125_v4 }
 0x4ed   :  { %2136 = vmatmul.mubr.f32.vlgmr.msra.gmra.mrb[0].mxu1 %v981_v23 }
 0x4ee   :  { %2534 = vmatpush3.bf16.msra.mxu1 %v3125_v4  ;;  %2170 = vmatprep.mubr.f32.mxu1 %v972_v47 }
 0x4ef   :  { %2536 = vmatprep.subr.bf16.mxu1 %v3129_v45 }
 0x4f2   :  { %2538 = vmatpush3.bf16.msra.mxu1 %v3129_v45 }
 0x4f3   :  { %2540 = vmatprep.subr.bf16.mxu1 %v3133_v35 }
 0x4f6   :  { %2542 = vmatpush3.bf16.msra.mxu1 %v3133_v35 }
 0x4f7   :  { %2544 = vmatprep.subr.bf16.mxu1 %v3137_v50 }
 0x4fa   :  { %2546 = vmatpush3.bf16.msra.mxu1 %v3137_v50 }
 0x4fb   :  { %2548 = vmatprep.subr.bf16.mxu1 %v3147_v29 }
 0x4fe   :  { %2550 = vmatpush3.bf16.msra.mxu1 %v3147_v29 }
 0x4ff   :  { %2552 = vmatprep.subr.bf16.mxu1 %v3163_v3 }
 0x502   :  { %2554 = vmatpush3.bf16.msra.mxu1 %v3163_v3 }
 0x503   :  { %2556 = vmatprep.subr.bf16.mxu1 %v3176_v21 }
 0x506   :  { %2558 = vmatpush3.bf16.msra.mxu1 %v3176_v21 }
 0x507   :  { %2560 = vmatprep.subr.bf16.mxu1 %v3184_v30 }
 0x50a   :  { %2562 = vmatpush3.bf16.msra.mxu1 %v3184_v30 }
 0x50b   :  { %2564 = vmatprep.subr.bf16.mxu1 %v2563_v38 }
 0x50d   :  { %2171 = vmatmul.mubr.f32.vlgmr.msra.gmra.mrb[0].mxu1 %v982_v48  ;;  %v3490_v48 = vand.u32 4294901760, %v3301_v61 }
 0x50e   :  { %2566 = vmatpush3.bf16.msra.mxu1 %v2563_v38  ;;  %2205 = vmatprep.mubr.f32.mxu1 %v3340_v16 }
 0x50f   :  { %2568 = vmatprep.subr.bf16.mxu1 %v2567_v15  ;;  %v2591_v5 = vpack.c.bf16 %v3490_v48, %v3489_v63 }
 0x512   :  { %2570 = vmatpush3.bf16.msra.mxu1 %v2567_v15 }
 0x513   :  { %2572 = vmatprep.subr.bf16.mxu1 %v2571_v0 }
 0x516   :  { %2574 = vmatpush3.bf16.msra.mxu1 %v2571_v0 }
 0x517   :  { %2576 = vmatprep.subr.bf16.mxu1 %v2575_v32 }
 0x51a   :  { %2578 = vmatpush3.bf16.msra.mxu1 %v2575_v32 }
 0x51b   :  { %2580 = vmatprep.subr.bf16.mxu1 %v2579_v1 }
 0x51e   :  { %2582 = vmatpush3.bf16.msra.mxu1 %v2579_v1 }
 0x51f   :  { %2584 = vmatprep.subr.bf16.mxu1 %v2583_v33 }
 0x522   :  { %2586 = vmatpush3.bf16.msra.mxu1 %v2583_v33 }
 0x523   :  { %2588 = vmatprep.subr.bf16.mxu1 %v2587_v55 }
 0x526   :  { %2590 = vmatpush3.bf16.msra.mxu1 %v2587_v55 }
 0x527   :  { %2592 = vmatprep.subr.bf16.mxu1 %v2591_v5 }
 0x52a   :  { %2594 = vmatpush3.bf16.msra.mxu1 %v2591_v5 }
 0x52b   :  { %2596 = vmatprep.subr.bf16.mxu1 %v3125_v4 }
 0x52d   :  { %2206 = vmatmul.mubr.f32.vlgmr.msra.gmra.mrb[0].mxu1 %v3343_v46 }
 0x52e   :  { %2598 = vmatpush3.bf16.msra.mxu1 %v3125_v4  ;;  %2240 = vmatprep.mubr.f32.mxu1 %v3340_v16  ;;  %v1606_v4 = vld [vmem:[%s3455_s8] ss:$0 sm:$0xff] }
 0x52f   :  { %2600 = vmatprep.subr.bf16.mxu1 %v3129_v45 }
 0x532   :  { %2602 = vmatpush3.bf16.msra.mxu1 %v3129_v45 }
 0x533   :  { %2604 = vmatprep.subr.bf16.mxu1 %v3133_v35 }
 0x536   :  { %2606 = vmatpush3.bf16.msra.mxu1 %v3133_v35 }
 0x537   :  { %2608 = vmatprep.subr.bf16.mxu1 %v3137_v50 }
 0x53a   :  { %2610 = vmatpush3.bf16.msra.mxu1 %v3137_v50 }
 0x53b   :  { %2612 = vmatprep.subr.bf16.mxu1 %v3147_v29 }
 0x53e   :  { %2614 = vmatpush3.bf16.msra.mxu1 %v3147_v29 }
 0x53f   :  { %2616 = vmatprep.subr.bf16.mxu1 %v3163_v3 }
 0x542   :  { %2618 = vmatpush3.bf16.msra.mxu1 %v3163_v3 }
 0x543   :  { %2620 = vmatprep.subr.bf16.mxu1 %v3176_v21 }
 0x546   :  { %2622 = vmatpush3.bf16.msra.mxu1 %v3176_v21 }
 0x547   :  { %2624 = vmatprep.subr.bf16.mxu1 %v3184_v30 }
 0x54a   :  { %2626 = vmatpush3.bf16.msra.mxu1 %v3184_v30 }
 0x54d   :  { %2241 = vmatmul.mubr.f32.vlgmr.msra.gmra.mrb[0].mxu1 %v3343_v46 }
 0x620   :  { %v2242_v45 = vpop.f32.mrb[0].mxu1 }
 0x621   :  { %v2629_v35 = vadd.f32 %v2242_v45, %v1606_v4  ;;  %v1563_v50 = vpop.f32.mrb[1].mxu1 }
 0x622   :  { %v2630_v29 = vadd.f32 %v1606_v4, %v1563_v50 }
 0x623   :  { %1574 = vst [vmem:[#allocation7 + $0x8] sm:$0xff] %v2629_v35 }
 0x624   :  { %1573 = vst [vmem:[#allocation7] sm:$0xff] %v2630_v29 }
 0x625   :  { %2723 = shalt.err (!%p2720_p6)
}
 0x626   :  { %s2724_s8 = scalar_lea.hbm %s3456_s9, 256 }
 0x627   :  { %p2725_p7 = scmp.ne.s32.totalorder %s3456_s9, %s2724_s8  ;;  %p2728_p8 = scmp.lt.u32.totalorder %s2724_s8, %s3456_s9 }
 0x629   :  { %p2730_p9 = pnand %p2728_p8, %p2725_p7 }
 0x62b   :  { %2733 = shalt.err (!%p2730_p9)
}
 0x62c   :  { %1586 = dma.vmem_to_hbm [thread:$0]  %s1581_s27, 256, %s3456_s9, [#allocation4], %s2741_s19, %s2741_s19, %s2742_s20  }
 0x62d   :  { %2738 = dma.done.wait [#allocation4], 256  }
 0x62e   :  { %2739 = vsyncadd [#allocation4], 4294967040 }
 0x62f   :  { %1590 = vsyncpa [#allocation3], 1 }
 0x630   :  { %1591 = vsyncpa [#allocation6], 1 }
 0x631   :  { %1592 = vsyncpa [#allocation4], 1 }

</bundles_post_ra>
